<compile_context>
chip_gen: v7x
topology: tpu7x:2x2x1
jax: 0.10.0
libtpu: 0.0.40
codegen_flags: <defaults>
</compile_context>

<pallas_src>
import functools

import jax
import jax.numpy as jnp
import numpy as np
from jax import lax
from jax.experimental import pallas as pl
from jax.experimental.pallas import tpu as pltpu


# ---------------------------------------------------------------------------
# Fused kernel: one (image, H-tile) block per grid step.
# ---------------------------------------------------------------------------
def _down_conv_kernel(xc_ref, xp_ref, xn_ref, w1_ref, b1_ref, w2_ref, b2_ref,
                      o_ref, pad1_ref, pad2_ref):
    # xc_ref  : (1, TH, 2, Wp, 2*Cin)   this tile's input rows (2x2-pool phases exposed)
    # xp_ref  : (1, 2,  2, Wp, 2*Cin)   2 pooled rows ABOVE the tile (clamped; unused at t==0)
    # xn_ref  : (1, 2,  2, Wp, 2*Cin)   2 pooled rows BELOW the tile (clamped; unused at t==last)
    # w1_ref  : (9*Cin,  Cout)          conv1 weights, (ky, kx, Cin) flattened, compute dtype
    # b1_ref  : (1, Cout)  f32          w2_ref: (9*Cout, Cout)    b2_ref: (1, Cout) f32
    # o_ref   : (1, TH, Wp, Cout)       channels-last output tile
    # pad1_ref: VMEM (TH+4, Wp+2, Cin)  zero-padded pooled tile  (conv1 input)
    # pad2_ref: VMEM (TH+2, Wp+2, Cout) zero-padded conv1 tile   (conv2 input)
    _, TH, _, Wp, _ = xc_ref.shape
    Cin = pad1_ref.shape[-1]
    Cout = o_ref.shape[-1]
    cdt = pad1_ref.dtype
    t = pl.program_id(1)
    t_last = pl.num_programs(1) - 1

    def pool2x2(blk):  # (rows, 2, Wp, 2*Cin) f32 -> (rows, Wp, Cin); pure VPU max
        m = jnp.maximum(blk[:, 0, :, :], blk[:, 1, :, :])      # rows 2h vs 2h+1
        return jnp.maximum(m[:, :, :Cin], m[:, :, Cin:])       # cols 2w vs 2w+1

    # ---- conv1 input: pooled rows [t*TH-2, t*TH+TH+2), zero outside the image, plus a
    # 1-column zero border.  Only thin borders are zeroed, every step (megacore-safe);
    # every element of the scratch is written exactly once per step.
    zcol1 = jnp.zeros((TH + 4, 1, Cin), cdt)
    pad1_ref[:, 0:1, :] = zcol1
    pad1_ref[:, Wp + 1:Wp + 2, :] = zcol1
    pad1_ref[2:TH + 2, 1:Wp + 1, :] = pool2x2(xc_ref[0]).astype(cdt)

    zrow1 = jnp.zeros((2, Wp, Cin), cdt)

    @pl.when(t == 0)
    def _():
        pad1_ref[0:2, 1:Wp + 1, :] = zrow1

    @pl.when(t > 0)
    def _():
        pad1_ref[0:2, 1:Wp + 1, :] = pool2x2(xp_ref[0]).astype(cdt)

    @pl.when(t == t_last)
    def _():
        pad1_ref[TH + 2:TH + 4, 1:Wp + 1, :] = zrow1

    @pl.when(t < t_last)
    def _():
        pad1_ref[TH + 2:TH + 4, 1:Wp + 1, :] = pool2x2(xn_ref[0]).astype(cdt)

    def conv3x3_relu(pad_ref, w_ref, b_ref, rows, cin, cout):
        # 3 accumulated MXU matmuls grouped by ky (K = 3*cin each): no 9x im2col slab,
        # f32 accumulator, compute-dtype (bf16/f32) operands.
        padded = pad_ref[...]                                   # (rows+2, Wp+2, cin)
        acc = jnp.zeros((rows * Wp, cout), jnp.float32)
        for ky in range(3):
            band = padded[ky:ky + rows]                         # (rows, Wp+2, cin)
            patch = jnp.concatenate(
                [band[:, kx:kx + Wp, :] for kx in range(3)], axis=-1
            ).reshape(rows * Wp, 3 * cin)                       # (rows*Wp, 3*cin)
            acc = acc + jnp.dot(patch, w_ref[ky * 3 * cin:(ky + 1) * 3 * cin, :],
                                preferred_element_type=jnp.float32)
        acc = acc + b_ref[...]                                  # f32 bias broadcast
        return jnp.maximum(acc, 0.0).reshape(rows, Wp, cout)    # f32

    # ---- conv1 over TH+2 rows (1-row halo each side feeds conv2) ----
    y1 = conv3x3_relu(pad1_ref, w1_ref, b1_ref, TH + 2, Cin, Cout)

    # ---- conv2 input: y1 rows [t*TH-1, t*TH+TH+1); rows outside the image must be the
    # conv's zero padding, so boundary-tile halo rows are overwritten with zeros.
    zcol2 = jnp.zeros((TH + 2, 1, Cout), cdt)
    pad2_ref[:, 0:1, :] = zcol2
    pad2_ref[:, Wp + 1:Wp + 2, :] = zcol2
    pad2_ref[:, 1:Wp + 1, :] = y1.astype(cdt)

    zrow2 = jnp.zeros((1, Wp, Cout), cdt)

    @pl.when(t == 0)
    def _():
        pad2_ref[0:1, 1:Wp + 1, :] = zrow2

    @pl.when(t == t_last)
    def _():
        pad2_ref[TH + 1:TH + 2, 1:Wp + 1, :] = zrow2

    # ---- conv2 -> TH output rows ----
    y2 = conv3x3_relu(pad2_ref, w2_ref, b2_ref, TH, Cout, Cout)
    o_ref[0] = y2.astype(o_ref.dtype)


# ---------------------------------------------------------------------------
# Wrapper
# ---------------------------------------------------------------------------
def oihw_to_hwio(w_oihw):
    """PyTorch Conv2d weight (out, in, kH, kW) -> HWIO layout used by this kernel."""
    return jnp.transpose(w_oihw, (2, 3, 1, 0))


def _pick_vmem_limit_bytes():
    # v5e/v6e have 128 MiB of VMEM, v7x only 64 MiB: budget ~3/4 of this chip's capacity.
    try:
        cap = pltpu.get_tpu_info().vmem_capacity_bytes
    except Exception:
        cap = 64 * 1024 * 1024
    return int(min(cap * 3 // 4, 100 * 1024 * 1024))


def down_conv(x_nchw, w1_hwio, b1, w2_hwio, b2, *, tile_h=None,
              compute_dtype=jnp.bfloat16):
    """Fused MaxPool2d(2,2) -> Conv3x3(pad=1)+ReLU -> Conv3x3(pad=1)+ReLU.

    x_nchw: (N, Cin, H, W); w1_hwio: (3,3,Cin,Cout); w2_hwio: (3,3,Cout,Cout); b*: (Cout,)
    compute_dtype: dtype of the MXU matmul operands (bf16 default; accumulation is f32).
    """
    N, Cin, H, W = x_nchw.shape
    Cout = w1_hwio.shape[-1]
    # PyTorch stores Conv2d weights as OIHW -- convert with oihw_to_hwio() first.
    assert w1_hwio.shape == (3, 3, Cin, Cout), w1_hwio.shape
    assert w2_hwio.shape == (3, 3, Cout, Cout), w2_hwio.shape
    assert b1.shape == (Cout,) and b2.shape == (Cout,)
    assert H % 2 == 0 and W % 2 == 0, "MaxPool2d(2, 2) path requires even H and W"
    Hp, Wp = H // 2, W // 2
    assert Hp >= 2, "need at least 2 pooled rows"

    # H tile: largest power-of-two divisor of Hp up to 32 (bounded VMEM, still big enough
    # to amortize the ~0.35us/step overhead).  Override via tile_h for per-chip tuning.
    if tile_h is None:
        tile_h = Hp
        for cand in (32, 16, 8, 4, 2):
            if cand <= Hp and Hp % cand == 0:
                tile_h = cand
                break
    n_h = Hp // tile_h
    assert Hp % tile_h == 0, (Hp, tile_h)
    assert n_h == 1 or tile_h % 2 == 0, "tile_h must be even when tiling"

    # NCHW -> channels-last, then a free row-major reshape exposing the 2x2-pool phases:
    # (N, Hp, 2, Wp, 2*Cin).  No pad / gather glue in the wrapper.
    x = jnp.transpose(x_nchw, (0, 2, 3, 1)).reshape(N, Hp, 2, Wp, 2 * Cin)

    # Weights flattened once for the grouped (K = 3*C) matmuls: (ky,kx,ci,co) -> (9*ci, co).
    w1f = w1_hwio.reshape(9 * Cin, Cout).astype(compute_dtype)
    w2f = w2_hwio.reshape(9 * Cout, Cout).astype(compute_dtype)
    b1f = b1.reshape(1, Cout).astype(jnp.float32)
    b2f = b2.reshape(1, Cout).astype(jnp.float32)

    th2 = tile_h // 2                 # halo blocks are 2 pooled rows
    last_halo_blk = Hp // 2 - 1

    cur_map = lambda n, t: (n, t, 0, 0, 0)
    prev_map = lambda n, t: (n, jnp.maximum(t * th2 - 1, 0), 0, 0, 0)
    next_map = lambda n, t: (n, jnp.minimum((t + 1) * th2, last_halo_blk), 0, 0, 0)
    const_map = lambda n, t: (0, 0)

    # NOTE: the constant-index weight/bias blocks are still double-buffered by the
    # pipeline; pl.Buffered(1) / a persistent VMEM copy would halve that footprint.
    # TODO(synk): add a W-tile grid axis (1-column halo per conv) for very wide images,
    # and optionally pad Cin/Cout to multiples of 128 for fully lane-dense stores.
    out_nhwc = pl.pallas_call(
        _down_conv_kernel,
        out_shape=jax.ShapeDtypeStruct((N, Hp, Wp, Cout), x_nchw.dtype),
        grid=(N, n_h),
        in_specs=[
            pl.BlockSpec((1, tile_h, 2, Wp, 2 * Cin), cur_map),
            pl.BlockSpec((1, 2, 2, Wp, 2 * Cin), prev_map),
            pl.BlockSpec((1, 2, 2, Wp, 2 * Cin), next_map),
            pl.BlockSpec((9 * Cin, Cout), const_map),
            pl.BlockSpec((1, Cout), const_map),
            pl.BlockSpec((9 * Cout, Cout), const_map),
            pl.BlockSpec((1, Cout), const_map),
        ],
        out_specs=pl.BlockSpec((1, tile_h, Wp, Cout), lambda n, t: (n, t, 0, 0)),
        scratch_shapes=[
            pltpu.VMEM((tile_h + 4, Wp + 2, Cin), compute_dtype),
            pltpu.VMEM((tile_h + 2, Wp + 2, Cout), compute_dtype),
        ],
        compiler_params=pltpu.CompilerParams(
            # Batch AND H-tile axes are independent -> both shard across v7x's 2 cores.
            dimension_semantics=("parallel", "parallel"),
            vmem_limit_bytes=_pick_vmem_limit_bytes(),
        ),
    )(x, x, x, w1f, b1f, w2f, b2f)

    return jnp.transpose(out_nhwc, (0, 3, 1, 2))  # channels-last -> NCHW (module contract)


# ---------------------------------------------------------------------------
# Pure-JAX reference (correctness check only).
# ---------------------------------------------------------------------------
def down_conv_ref(x_nchw, w1, b1, w2, b2):
    x = jnp.transpose(x_nchw, (0, 2, 3, 1))
    N, H, W, C = x.shape
    x = jnp.max(x.reshape(N, H // 2, 2, W // 2, 2, C), axis=(2, 4))

    def conv(x, w, b):
        y = lax.conv_general_dilated(
            x, w, window_strides=(1, 1), padding="SAME",
            dimension_numbers=("NHWC", "HWIO", "NHWC"),
            precision=lax.Precision.HIGHEST,
        )
        return jnp.maximum(y + b[None, None, None, :], 0.0)

    x = conv(x, w1, b1)
    x = conv(x, w2, b2)
    return jnp.transpose(x, (0, 3, 1, 2))


if __name__ == "__main__":
    key = jax.random.PRNGKey(0)
    k_x, k_w1, k_b1, k_w2, k_b2 = jax.random.split(key, 5)

    N, Cin, H, W = 2, 4, 16, 16
    Cout = 8

    x = jax.random.normal(k_x, (N, Cin, H, W), dtype=jnp.float32)
    # Parameters generated in PyTorch's native OIHW layout, converted to HWIO.
    w1_oihw = jax.random.normal(k_w1, (Cout, Cin, 3, 3), dtype=jnp.float32) * 0.1
    w2_oihw = jax.random.normal(k_w2, (Cout, Cout, 3, 3), dtype=jnp.float32) * 0.1
    b1 = jax.random.normal(k_b1, (Cout,), dtype=jnp.float32) * 0.1
    b2 = jax.random.normal(k_b2, (Cout,), dtype=jnp.float32) * 0.1
    w1 = oihw_to_hwio(w1_oihw)
    w2 = oihw_to_hwio(w2_oihw)

    ref = down_conv_ref(x, w1, b1, w2, b2)

    # 1) f32 matmul path, 4 H-tiles (exercises the halo / boundary logic) -- strict check.
    f32_fn = jax.jit(functools.partial(down_conv, tile_h=2, compute_dtype=jnp.float32))
    out_f32 = jax.block_until_ready(f32_fn(x, w1, b1, w2, b2))
    assert out_f32.shape == (N, Cout, H // 2, W // 2)
    np.testing.assert_allclose(np.asarray(out_f32), np.asarray(ref), rtol=1e-4, atol=1e-5)

    # 2) default bf16-operand path (f32 accumulation), auto tile -- bf16-level tolerance.
    bf16_fn = jax.jit(functools.partial(down_conv))
    out_bf16 = jax.block_until_ready(bf16_fn(x, w1, b1, w2, b2))
    np.testing.assert_allclose(np.asarray(out_bf16), np.asarray(ref), rtol=5e-2, atol=5e-2)

    print("KERNEL_OK")
</pallas_src>

<mosaic_0001>
module attributes {stable_mosaic.version = 11 : i64} {
  func.func @_down_conv_kernel(%arg0: i32, %arg1: i32, %arg2: memref<1x2x2x8x8xf32, #tpu.memory_space<vmem>>, %arg3: memref<1x2x2x8x8xf32, #tpu.memory_space<vmem>>, %arg4: memref<1x2x2x8x8xf32, #tpu.memory_space<vmem>>, %arg5: memref<36x8xf32, #tpu.memory_space<vmem>>, %arg6: memref<1x8xf32, #tpu.memory_space<vmem>>, %arg7: memref<72x8xf32, #tpu.memory_space<vmem>>, %arg8: memref<1x8xf32, #tpu.memory_space<vmem>>, %arg9: memref<1x2x8x8xf32, #tpu.memory_space<vmem>>, %arg10: memref<6x10x4xf32, #tpu.memory_space<vmem>>, %arg11: memref<4x10x8xf32, #tpu.memory_space<vmem>>) attributes {dimension_semantics = [#tpu.dimension_semantics<parallel>, #tpu.dimension_semantics<parallel>], iteration_bounds = array<i64: 2, 4>, scalar_prefetch = 0 : i64, scratch_operands = 2 : i64, tpu.core_type = #tpu.core_type<tc>, window_params = [{transform_indices = @transform_0, window_bounds = array<i64: 1, 2, 2, 8, 8>}, {transform_indices = @transform_1, window_bounds = array<i64: 1, 2, 2, 8, 8>}, {transform_indices = @transform_2, window_bounds = array<i64: 1, 2, 2, 8, 8>}, {pipeline_mode = #tpu.pipeline_mode<synchronous>, transform_indices = @transform_3, window_bounds = array<i64: 36, 8>}, {pipeline_mode = #tpu.pipeline_mode<synchronous>, transform_indices = @transform_4, window_bounds = array<i64: 1, 8>}, {pipeline_mode = #tpu.pipeline_mode<synchronous>, transform_indices = @transform_5, window_bounds = array<i64: 72, 8>}, {pipeline_mode = #tpu.pipeline_mode<synchronous>, transform_indices = @transform_6, window_bounds = array<i64: 1, 8>}, {transform_indices = @transform_7, window_bounds = array<i64: 1, 2, 8, 8>}]} {
    %cst = arith.constant 0.000000e+00 : f32
    %0 = vector.broadcast %cst : f32 to vector<6x1x4xf32>
    %c0 = arith.constant 0 : index
    %c0_0 = arith.constant 0 : index
    %c0_1 = arith.constant 0 : index
    %1 = vector.load %arg10[%c0, %c0_0, %c0_1] : memref<6x10x4xf32, #tpu.memory_space<vmem>>, vector<6x1x4xf32>
    tpu.vector_store %arg10[%c0, %c0_0, %c0_1], %0 {strides = array<i32>} : memref<6x10x4xf32, #tpu.memory_space<vmem>>, vector<6x1x4xf32>,
    %c0_2 = arith.constant 0 : index
    %c9 = arith.constant 9 : index
    %c0_3 = arith.constant 0 : index
    %2 = vector.load %arg10[%c0_2, %c9, %c0_3] : memref<6x10x4xf32, #tpu.memory_space<vmem>>, vector<6x1x4xf32>
    tpu.vector_store %arg10[%c0_2, %c9, %c0_3], %0 {strides = array<i32>} : memref<6x10x4xf32, #tpu.memory_space<vmem>>, vector<6x1x4xf32>,
    %c0_4 = arith.constant 0 : index
    %c0_5 = arith.constant 0 : index
    %c0_6 = arith.constant 0 : index
    %c0_7 = arith.constant 0 : index
    %c0_8 = arith.constant 0 : index
    %3 = vector.load %arg2[%c0_4, %c0_5, %c0_6, %c0_7, %c0_8] : memref<1x2x2x8x8xf32, #tpu.memory_space<vmem>>, vector<1x2x2x8x8xf32>
    %4 = vector.shape_cast %3 : vector<1x2x2x8x8xf32> to vector<2x2x8x8xf32>
    %5 = vector.extract_strided_slice %4 {offsets = [0, 0, 0, 0], sizes = [2, 1, 8, 8], strides = [1, 1, 1, 1]} : vector<2x2x8x8xf32> to vector<2x1x8x8xf32>
    %6 = vector.shape_cast %5 : vector<2x1x8x8xf32> to vector<2x8x8xf32>
    %7 = vector.extract_strided_slice %4 {offsets = [0, 1, 0, 0], sizes = [2, 1, 8, 8], strides = [1, 1, 1, 1]} : vector<2x2x8x8xf32> to vector<2x1x8x8xf32>
    %8 = vector.shape_cast %7 : vector<2x1x8x8xf32> to vector<2x8x8xf32>
    %9 = arith.maximumf %6, %8 : vector<2x8x8xf32>
    %10 = vector.extract_strided_slice %9 {offsets = [0, 0, 0], sizes = [2, 8, 4], strides = [1, 1, 1]} : vector<2x8x8xf32> to vector<2x8x4xf32>
    %11 = vector.extract_strided_slice %9 {offsets = [0, 0, 4], sizes = [2, 8, 4], strides = [1, 1, 1]} : vector<2x8x8xf32> to vector<2x8x4xf32>
    %12 = arith.maximumf %10, %11 : vector<2x8x4xf32>
    %c2 = arith.constant 2 : index
    %c1 = arith.constant 1 : index
    %c0_9 = arith.constant 0 : index
    %13 = vector.load %arg10[%c2, %c1, %c0_9] : memref<6x10x4xf32, #tpu.memory_space<vmem>>, vector<2x8x4xf32>
    tpu.vector_store %arg10[%c2, %c1, %c0_9], %12 {strides = array<i32>} : memref<6x10x4xf32, #tpu.memory_space<vmem>>, vector<2x8x4xf32>,
    %cst_10 = arith.constant 0.000000e+00 : f32
    %14 = vector.broadcast %cst_10 : f32 to vector<2x8x4xf32>
    %c0_i32 = arith.constant 0 : i32
    %15 = arith.cmpi eq, %arg1, %c0_i32 : i32
    %16 = arith.extui %15 : i1 to i32
    %c0_i32_11 = arith.constant 0 : i32
    %17 = arith.cmpi ne, %16, %c0_i32_11 : i32
    scf.if %17 {
      %c0_65 = arith.constant 0 : index
      %c1_66 = arith.constant 1 : index
      %c0_67 = arith.constant 0 : index
      %111 = vector.load %arg10[%c0_65, %c1_66, %c0_67] : memref<6x10x4xf32, #tpu.memory_space<vmem>>, vector<2x8x4xf32>
      tpu.vector_store %arg10[%c0_65, %c1_66, %c0_67], %14 {strides = array<i32>} : memref<6x10x4xf32, #tpu.memory_space<vmem>>, vector<2x8x4xf32>,
    } else {
    }
    %c0_i32_12 = arith.constant 0 : i32
    %18 = arith.cmpi sgt, %arg1, %c0_i32_12 : i32
    %19 = arith.extui %18 : i1 to i32
    %c0_i32_13 = arith.constant 0 : i32
    %20 = arith.cmpi ne, %19, %c0_i32_13 : i32
    scf.if %20 {
      %c0_65 = arith.constant 0 : index
      %c0_66 = arith.constant 0 : index
      %c0_67 = arith.constant 0 : index
      %c0_68 = arith.constant 0 : index
      %c0_69 = arith.constant 0 : index
      %111 = vector.load %arg3[%c0_65, %c0_66, %c0_67, %c0_68, %c0_69] : memref<1x2x2x8x8xf32, #tpu.memory_space<vmem>>, vector<1x2x2x8x8xf32>
      %112 = vector.shape_cast %111 : vector<1x2x2x8x8xf32> to vector<2x2x8x8xf32>
      %113 = vector.extract_strided_slice %112 {offsets = [0, 0, 0, 0], sizes = [2, 1, 8, 8], strides = [1, 1, 1, 1]} : vector<2x2x8x8xf32> to vector<2x1x8x8xf32>
      %114 = vector.shape_cast %113 : vector<2x1x8x8xf32> to vector<2x8x8xf32>
      %115 = vector.extract_strided_slice %112 {offsets = [0, 1, 0, 0], sizes = [2, 1, 8, 8], strides = [1, 1, 1, 1]} : vector<2x2x8x8xf32> to vector<2x1x8x8xf32>
      %116 = vector.shape_cast %115 : vector<2x1x8x8xf32> to vector<2x8x8xf32>
      %117 = arith.maximumf %114, %116 : vector<2x8x8xf32>
      %118 = vector.extract_strided_slice %117 {offsets = [0, 0, 0], sizes = [2, 8, 4], strides = [1, 1, 1]} : vector<2x8x8xf32> to vector<2x8x4xf32>
      %119 = vector.extract_strided_slice %117 {offsets = [0, 0, 4], sizes = [2, 8, 4], strides = [1, 1, 1]} : vector<2x8x8xf32> to vector<2x8x4xf32>
      %120 = arith.maximumf %118, %119 : vector<2x8x4xf32>
      %c0_70 = arith.constant 0 : index
      %c1_71 = arith.constant 1 : index
      %c0_72 = arith.constant 0 : index
      %121 = vector.load %arg10[%c0_70, %c1_71, %c0_72] : memref<6x10x4xf32, #tpu.memory_space<vmem>>, vector<2x8x4xf32>
      tpu.vector_store %arg10[%c0_70, %c1_71, %c0_72], %120 {strides = array<i32>} : memref<6x10x4xf32, #tpu.memory_space<vmem>>, vector<2x8x4xf32>,
    } else {
    }
    %c3_i32 = arith.constant 3 : i32
    %21 = arith.cmpi eq, %arg1, %c3_i32 : i32
    %22 = arith.extui %21 : i1 to i32
    %c0_i32_14 = arith.constant 0 : i32
    %23 = arith.cmpi ne, %22, %c0_i32_14 : i32
    scf.if %23 {
      %c4 = arith.constant 4 : index
      %c1_65 = arith.constant 1 : index
      %c0_66 = arith.constant 0 : index
      %111 = vector.load %arg10[%c4, %c1_65, %c0_66] : memref<6x10x4xf32, #tpu.memory_space<vmem>>, vector<2x8x4xf32>
      tpu.vector_store %arg10[%c4, %c1_65, %c0_66], %14 {strides = array<i32>} : memref<6x10x4xf32, #tpu.memory_space<vmem>>, vector<2x8x4xf32>,
    } else {
    }
    %c3_i32_15 = arith.constant 3 : i32
    %24 = arith.cmpi slt, %arg1, %c3_i32_15 : i32
    %25 = arith.extui %24 : i1 to i32
    %c0_i32_16 = arith.constant 0 : i32
    %26 = arith.cmpi ne, %25, %c0_i32_16 : i32
    scf.if %26 {
      %c0_65 = arith.constant 0 : index
      %c0_66 = arith.constant 0 : index
      %c0_67 = arith.constant 0 : index
      %c0_68 = arith.constant 0 : index
      %c0_69 = arith.constant 0 : index
      %111 = vector.load %arg4[%c0_65, %c0_66, %c0_67, %c0_68, %c0_69] : memref<1x2x2x8x8xf32, #tpu.memory_space<vmem>>, vector<1x2x2x8x8xf32>
      %112 = vector.shape_cast %111 : vector<1x2x2x8x8xf32> to vector<2x2x8x8xf32>
      %113 = vector.extract_strided_slice %112 {offsets = [0, 0, 0, 0], sizes = [2, 1, 8, 8], strides = [1, 1, 1, 1]} : vector<2x2x8x8xf32> to vector<2x1x8x8xf32>
      %114 = vector.shape_cast %113 : vector<2x1x8x8xf32> to vector<2x8x8xf32>
      %115 = vector.extract_strided_slice %112 {offsets = [0, 1, 0, 0], sizes = [2, 1, 8, 8], strides = [1, 1, 1, 1]} : vector<2x2x8x8xf32> to vector<2x1x8x8xf32>
      %116 = vector.shape_cast %115 : vector<2x1x8x8xf32> to vector<2x8x8xf32>
      %117 = arith.maximumf %114, %116 : vector<2x8x8xf32>
      %118 = vector.extract_strided_slice %117 {offsets = [0, 0, 0], sizes = [2, 8, 4], strides = [1, 1, 1]} : vector<2x8x8xf32> to vector<2x8x4xf32>
      %119 = vector.extract_strided_slice %117 {offsets = [0, 0, 4], sizes = [2, 8, 4], strides = [1, 1, 1]} : vector<2x8x8xf32> to vector<2x8x4xf32>
      %120 = arith.maximumf %118, %119 : vector<2x8x4xf32>
      %c4 = arith.constant 4 : index
      %c1_70 = arith.constant 1 : index
      %c0_71 = arith.constant 0 : index
      %121 = vector.load %arg10[%c4, %c1_70, %c0_71] : memref<6x10x4xf32, #tpu.memory_space<vmem>>, vector<2x8x4xf32>
      tpu.vector_store %arg10[%c4, %c1_70, %c0_71], %120 {strides = array<i32>} : memref<6x10x4xf32, #tpu.memory_space<vmem>>, vector<2x8x4xf32>,
    } else {
    }
    %c0_17 = arith.constant 0 : index
    %c0_18 = arith.constant 0 : index
    %c0_19 = arith.constant 0 : index
    %27 = vector.load %arg10[%c0_17, %c0_18, %c0_19] : memref<6x10x4xf32, #tpu.memory_space<vmem>>, vector<6x10x4xf32>
    %cst_20 = arith.constant 0.000000e+00 : f32
    %28 = vector.broadcast %cst_20 : f32 to vector<32x8xf32>
    %29 = vector.extract_strided_slice %27 {offsets = [0, 0, 0], sizes = [4, 10, 4], strides = [1, 1, 1]} : vector<6x10x4xf32> to vector<4x10x4xf32>
    %30 = vector.extract_strided_slice %29 {offsets = [0, 0, 0], sizes = [4, 8, 4], strides = [1, 1, 1]} : vector<4x10x4xf32> to vector<4x8x4xf32>
    %31 = vector.extract_strided_slice %29 {offsets = [0, 1, 0], sizes = [4, 8, 4], strides = [1, 1, 1]} : vector<4x10x4xf32> to vector<4x8x4xf32>
    %32 = vector.extract_strided_slice %29 {offsets = [0, 2, 0], sizes = [4, 8, 4], strides = [1, 1, 1]} : vector<4x10x4xf32> to vector<4x8x4xf32>
    %33 = tpu.concatenate %30, %31, %32 in 2 : vector<4x8x4xf32>, vector<4x8x4xf32>, vector<4x8x4xf32> -> vector<4x8x12xf32>
    %34 = vector.shape_cast %33 : vector<4x8x12xf32> to vector<32x12xf32>
    %c0_21 = arith.constant 0 : index
    %c0_22 = arith.constant 0 : index
    %35 = vector.load %arg5[%c0_21, %c0_22] : memref<36x8xf32, #tpu.memory_space<vmem>>, vector<12x8xf32>
    %cst_23 = arith.constant dense<0.000000e+00> : vector<32x8xf32>
    %36 = tpu.matmul %34, %35, %cst_23 {dimension_numbers = #tpu.dot_dimension_numbers<[1], [0], [0], [1], [0, 0, 1, 1], [], []>} : vector<32x12xf32>, vector<12x8xf32>, vector<32x8xf32> -> vector<32x8xf32>
    %37 = arith.addf %28, %36 : vector<32x8xf32>
    %38 = vector.extract_strided_slice %27 {offsets = [1, 0, 0], sizes = [4, 10, 4], strides = [1, 1, 1]} : vector<6x10x4xf32> to vector<4x10x4xf32>
    %39 = vector.extract_strided_slice %38 {offsets = [0, 0, 0], sizes = [4, 8, 4], strides = [1, 1, 1]} : vector<4x10x4xf32> to vector<4x8x4xf32>
    %40 = vector.extract_strided_slice %38 {offsets = [0, 1, 0], sizes = [4, 8, 4], strides = [1, 1, 1]} : vector<4x10x4xf32> to vector<4x8x4xf32>
    %41 = vector.extract_strided_slice %38 {offsets = [0, 2, 0], sizes = [4, 8, 4], strides = [1, 1, 1]} : vector<4x10x4xf32> to vector<4x8x4xf32>
    %42 = tpu.concatenate %39, %40, %41 in 2 : vector<4x8x4xf32>, vector<4x8x4xf32>, vector<4x8x4xf32> -> vector<4x8x12xf32>
    %43 = vector.shape_cast %42 : vector<4x8x12xf32> to vector<32x12xf32>
    %c12 = arith.constant 12 : index
    %c0_24 = arith.constant 0 : index
    %44 = vector.load %arg5[%c12, %c0_24] : memref<36x8xf32, #tpu.memory_space<vmem>>, vector<12x8xf32>
    %cst_25 = arith.constant dense<0.000000e+00> : vector<32x8xf32>
    %45 = tpu.matmul %43, %44, %cst_25 {dimension_numbers = #tpu.dot_dimension_numbers<[1], [0], [0], [1], [0, 0, 1, 1], [], []>} : vector<32x12xf32>, vector<12x8xf32>, vector<32x8xf32> -> vector<32x8xf32>
    %46 = arith.addf %37, %45 : vector<32x8xf32>
    %47 = vector.extract_strided_slice %27 {offsets = [2, 0, 0], sizes = [4, 10, 4], strides = [1, 1, 1]} : vector<6x10x4xf32> to vector<4x10x4xf32>
    %48 = vector.extract_strided_slice %47 {offsets = [0, 0, 0], sizes = [4, 8, 4], strides = [1, 1, 1]} : vector<4x10x4xf32> to vector<4x8x4xf32>
    %49 = vector.extract_strided_slice %47 {offsets = [0, 1, 0], sizes = [4, 8, 4], strides = [1, 1, 1]} : vector<4x10x4xf32> to vector<4x8x4xf32>
    %50 = vector.extract_strided_slice %47 {offsets = [0, 2, 0], sizes = [4, 8, 4], strides = [1, 1, 1]} : vector<4x10x4xf32> to vector<4x8x4xf32>
    %51 = tpu.concatenate %48, %49, %50 in 2 : vector<4x8x4xf32>, vector<4x8x4xf32>, vector<4x8x4xf32> -> vector<4x8x12xf32>
    %52 = vector.shape_cast %51 : vector<4x8x12xf32> to vector<32x12xf32>
    %c24 = arith.constant 24 : index
    %c0_26 = arith.constant 0 : index
    %53 = vector.load %arg5[%c24, %c0_26] : memref<36x8xf32, #tpu.memory_space<vmem>>, vector<12x8xf32>
    %cst_27 = arith.constant dense<0.000000e+00> : vector<32x8xf32>
    %54 = tpu.matmul %52, %53, %cst_27 {dimension_numbers = #tpu.dot_dimension_numbers<[1], [0], [0], [1], [0, 0, 1, 1], [], []>} : vector<32x12xf32>, vector<12x8xf32>, vector<32x8xf32> -> vector<32x8xf32>
    %55 = arith.addf %46, %54 : vector<32x8xf32>
    %c0_28 = arith.constant 0 : index
    %c0_29 = arith.constant 0 : index
    %56 = vector.load %arg6[%c0_28, %c0_29] : memref<1x8xf32, #tpu.memory_space<vmem>>, vector<1x8xf32>
    %57 = vector.broadcast %56 : vector<1x8xf32> to vector<32x8xf32>
    %58 = arith.addf %55, %57 : vector<32x8xf32>
    %cst_30 = arith.constant 0.000000e+00 : f32
    %59 = vector.broadcast %cst_30 : f32 to vector<32x8xf32>
    %60 = arith.maximumf %58, %59 : vector<32x8xf32>
    %61 = vector.shape_cast %60 : vector<32x8xf32> to vector<4x8x8xf32>
    %cst_31 = arith.constant 0.000000e+00 : f32
    %62 = vector.broadcast %cst_31 : f32 to vector<4x1x8xf32>
    %c0_32 = arith.constant 0 : index
    %c0_33 = arith.constant 0 : index
    %c0_34 = arith.constant 0 : index
    %63 = vector.load %arg11[%c0_32, %c0_33, %c0_34] : memref<4x10x8xf32, #tpu.memory_space<vmem>>, vector<4x1x8xf32>
    tpu.vector_store %arg11[%c0_32, %c0_33, %c0_34], %62 {strides = array<i32>} : memref<4x10x8xf32, #tpu.memory_space<vmem>>, vector<4x1x8xf32>,
    %c0_35 = arith.constant 0 : index
    %c9_36 = arith.constant 9 : index
    %c0_37 = arith.constant 0 : index
    %64 = vector.load %arg11[%c0_35, %c9_36, %c0_37] : memref<4x10x8xf32, #tpu.memory_space<vmem>>, vector<4x1x8xf32>
    tpu.vector_store %arg11[%c0_35, %c9_36, %c0_37], %62 {strides = array<i32>} : memref<4x10x8xf32, #tpu.memory_space<vmem>>, vector<4x1x8xf32>,
    %c0_38 = arith.constant 0 : index
    %c1_39 = arith.constant 1 : index
    %c0_40 = arith.constant 0 : index
    %65 = vector.load %arg11[%c0_38, %c1_39, %c0_40] : memref<4x10x8xf32, #tpu.memory_space<vmem>>, vector<4x8x8xf32>
    tpu.vector_store %arg11[%c0_38, %c1_39, %c0_40], %61 {strides = array<i32>} : memref<4x10x8xf32, #tpu.memory_space<vmem>>, vector<4x8x8xf32>,
    %cst_41 = arith.constant 0.000000e+00 : f32
    %66 = vector.broadcast %cst_41 : f32 to vector<1x8x8xf32>
    %c0_i32_42 = arith.constant 0 : i32
    %67 = arith.cmpi eq, %arg1, %c0_i32_42 : i32
    %68 = arith.extui %67 : i1 to i32
    %c0_i32_43 = arith.constant 0 : i32
    %69 = arith.cmpi ne, %68, %c0_i32_43 : i32
    scf.if %69 {
      %c0_65 = arith.constant 0 : index
      %c1_66 = arith.constant 1 : index
      %c0_67 = arith.constant 0 : index
      %111 = vector.load %arg11[%c0_65, %c1_66, %c0_67] : memref<4x10x8xf32, #tpu.memory_space<vmem>>, vector<1x8x8xf32>
      tpu.vector_store %arg11[%c0_65, %c1_66, %c0_67], %66 {strides = array<i32>} : memref<4x10x8xf32, #tpu.memory_space<vmem>>, vector<1x8x8xf32>,
    } else {
    }
    %c3_i32_44 = arith.constant 3 : i32
    %70 = arith.cmpi eq, %arg1, %c3_i32_44 : i32
    %71 = arith.extui %70 : i1 to i32
    %c0_i32_45 = arith.constant 0 : i32
    %72 = arith.cmpi ne, %71, %c0_i32_45 : i32
    scf.if %72 {
      %c3 = arith.constant 3 : index
      %c1_65 = arith.constant 1 : index
      %c0_66 = arith.constant 0 : index
      %111 = vector.load %arg11[%c3, %c1_65, %c0_66] : memref<4x10x8xf32, #tpu.memory_space<vmem>>, vector<1x8x8xf32>
      tpu.vector_store %arg11[%c3, %c1_65, %c0_66], %66 {strides = array<i32>} : memref<4x10x8xf32, #tpu.memory_space<vmem>>, vector<1x8x8xf32>,
    } else {
    }
    %c0_46 = arith.constant 0 : index
    %c0_47 = arith.constant 0 : index
    %c0_48 = arith.constant 0 : index
    %73 = vector.load %arg11[%c0_46, %c0_47, %c0_48] : memref<4x10x8xf32, #tpu.memory_space<vmem>>, vector<4x10x8xf32>
    %cst_49 = arith.constant 0.000000e+00 : f32
    %74 = vector.broadcast %cst_49 : f32 to vector<16x8xf32>
    %75 = vector.extract_strided_slice %73 {offsets = [0, 0, 0], sizes = [2, 10, 8], strides = [1, 1, 1]} : vector<4x10x8xf32> to vector<2x10x8xf32>
    %76 = vector.extract_strided_slice %75 {offsets = [0, 0, 0], sizes = [2, 8, 8], strides = [1, 1, 1]} : vector<2x10x8xf32> to vector<2x8x8xf32>
    %77 = vector.extract_strided_slice %75 {offsets = [0, 1, 0], sizes = [2, 8, 8], strides = [1, 1, 1]} : vector<2x10x8xf32> to vector<2x8x8xf32>
    %78 = vector.extract_strided_slice %75 {offsets = [0, 2, 0], sizes = [2, 8, 8], strides = [1, 1, 1]} : vector<2x10x8xf32> to vector<2x8x8xf32>
    %79 = tpu.concatenate %76, %77, %78 in 2 : vector<2x8x8xf32>, vector<2x8x8xf32>, vector<2x8x8xf32> -> vector<2x8x24xf32>
    %80 = vector.shape_cast %79 : vector<2x8x24xf32> to vector<16x24xf32>
    %c0_50 = arith.constant 0 : index
    %c0_51 = arith.constant 0 : index
    %81 = vector.load %arg7[%c0_50, %c0_51] : memref<72x8xf32, #tpu.memory_space<vmem>>, vector<24x8xf32>
    %cst_52 = arith.constant dense<0.000000e+00> : vector<16x8xf32>
    %82 = tpu.matmul %80, %81, %cst_52 {dimension_numbers = #tpu.dot_dimension_numbers<[1], [0], [0], [1], [0, 0, 1, 1], [], []>} : vector<16x24xf32>, vector<24x8xf32>, vector<16x8xf32> -> vector<16x8xf32>
    %83 = arith.addf %74, %82 : vector<16x8xf32>
    %84 = vector.extract_strided_slice %73 {offsets = [1, 0, 0], sizes = [2, 10, 8], strides = [1, 1, 1]} : vector<4x10x8xf32> to vector<2x10x8xf32>
    %85 = vector.extract_strided_slice %84 {offsets = [0, 0, 0], sizes = [2, 8, 8], strides = [1, 1, 1]} : vector<2x10x8xf32> to vector<2x8x8xf32>
    %86 = vector.extract_strided_slice %84 {offsets = [0, 1, 0], sizes = [2, 8, 8], strides = [1, 1, 1]} : vector<2x10x8xf32> to vector<2x8x8xf32>
    %87 = vector.extract_strided_slice %84 {offsets = [0, 2, 0], sizes = [2, 8, 8], strides = [1, 1, 1]} : vector<2x10x8xf32> to vector<2x8x8xf32>
    %88 = tpu.concatenate %85, %86, %87 in 2 : vector<2x8x8xf32>, vector<2x8x8xf32>, vector<2x8x8xf32> -> vector<2x8x24xf32>
    %89 = vector.shape_cast %88 : vector<2x8x24xf32> to vector<16x24xf32>
    %c24_53 = arith.constant 24 : index
    %c0_54 = arith.constant 0 : index
    %90 = vector.load %arg7[%c24_53, %c0_54] : memref<72x8xf32, #tpu.memory_space<vmem>>, vector<24x8xf32>
    %cst_55 = arith.constant dense<0.000000e+00> : vector<16x8xf32>
    %91 = tpu.matmul %89, %90, %cst_55 {dimension_numbers = #tpu.dot_dimension_numbers<[1], [0], [0], [1], [0, 0, 1, 1], [], []>} : vector<16x24xf32>, vector<24x8xf32>, vector<16x8xf32> -> vector<16x8xf32>
    %92 = arith.addf %83, %91 : vector<16x8xf32>
    %93 = vector.extract_strided_slice %73 {offsets = [2, 0, 0], sizes = [2, 10, 8], strides = [1, 1, 1]} : vector<4x10x8xf32> to vector<2x10x8xf32>
    %94 = vector.extract_strided_slice %93 {offsets = [0, 0, 0], sizes = [2, 8, 8], strides = [1, 1, 1]} : vector<2x10x8xf32> to vector<2x8x8xf32>
    %95 = vector.extract_strided_slice %93 {offsets = [0, 1, 0], sizes = [2, 8, 8], strides = [1, 1, 1]} : vector<2x10x8xf32> to vector<2x8x8xf32>
    %96 = vector.extract_strided_slice %93 {offsets = [0, 2, 0], sizes = [2, 8, 8], strides = [1, 1, 1]} : vector<2x10x8xf32> to vector<2x8x8xf32>
    %97 = tpu.concatenate %94, %95, %96 in 2 : vector<2x8x8xf32>, vector<2x8x8xf32>, vector<2x8x8xf32> -> vector<2x8x24xf32>
    %98 = vector.shape_cast %97 : vector<2x8x24xf32> to vector<16x24xf32>
    %c48 = arith.constant 48 : index
    %c0_56 = arith.constant 0 : index
    %99 = vector.load %arg7[%c48, %c0_56] : memref<72x8xf32, #tpu.memory_space<vmem>>, vector<24x8xf32>
    %cst_57 = arith.constant dense<0.000000e+00> : vector<16x8xf32>
    %100 = tpu.matmul %98, %99, %cst_57 {dimension_numbers = #tpu.dot_dimension_numbers<[1], [0], [0], [1], [0, 0, 1, 1], [], []>} : vector<16x24xf32>, vector<24x8xf32>, vector<16x8xf32> -> vector<16x8xf32>
    %101 = arith.addf %92, %100 : vector<16x8xf32>
    %c0_58 = arith.constant 0 : index
    %c0_59 = arith.constant 0 : index
    %102 = vector.load %arg8[%c0_58, %c0_59] : memref<1x8xf32, #tpu.memory_space<vmem>>, vector<1x8xf32>
    %103 = vector.broadcast %102 : vector<1x8xf32> to vector<16x8xf32>
    %104 = arith.addf %101, %103 : vector<16x8xf32>
    %cst_60 = arith.constant 0.000000e+00 : f32
    %105 = vector.broadcast %cst_60 : f32 to vector<16x8xf32>
    %106 = arith.maximumf %104, %105 : vector<16x8xf32>
    %107 = vector.shape_cast %106 : vector<16x8xf32> to vector<2x8x8xf32>
    %c0_61 = arith.constant 0 : index
    %c0_62 = arith.constant 0 : index
    %c0_63 = arith.constant 0 : index
    %c0_64 = arith.constant 0 : index
    %108 = vector.load %arg9[%c0_61, %c0_62, %c0_63, %c0_64] : memref<1x2x8x8xf32, #tpu.memory_space<vmem>>, vector<1x2x8x8xf32>
    %109 = vector.shape_cast %108 : vector<1x2x8x8xf32> to vector<2x8x8xf32>
    %110 = vector.shape_cast %107 : vector<2x8x8xf32> to vector<1x2x8x8xf32>
    tpu.vector_store %arg9[%c0_61, %c0_62, %c0_63, %c0_64], %110 {strides = array<i32>} : memref<1x2x8x8xf32, #tpu.memory_space<vmem>>, vector<1x2x8x8xf32>,
    return
  }
  func.func @transform_0(%arg0: i32, %arg1: i32) -> (i32, i32, i32, i32, i32) {
    %c0_i32 = arith.constant 0 : i32
    %c0_i32_0 = arith.constant 0 : i32
    %c0_i32_1 = arith.constant 0 : i32
    %c0_i32_2 = arith.constant 0 : i32
    return %arg0, %arg1, %c0_i32, %c0_i32_0, %c0_i32_1 : i32, i32, i32, i32, i32
  }
  func.func @transform_1(%arg0: i32, %arg1: i32) -> (i32, i32, i32, i32, i32) {
    %c1_i32 = arith.constant 1 : i32
    %0 = arith.muli %arg1, %c1_i32 : i32
    %c1_i32_0 = arith.constant 1 : i32
    %1 = arith.subi %0, %c1_i32_0 : i32
    %c0_i32 = arith.constant 0 : i32
    %2 = arith.maxsi %1, %c0_i32 : i32
    %c0_i32_1 = arith.constant 0 : i32
    %c0_i32_2 = arith.constant 0 : i32
    %c0_i32_3 = arith.constant 0 : i32
    %c0_i32_4 = arith.constant 0 : i32
    return %arg0, %2, %c0_i32_1, %c0_i32_2, %c0_i32_3 : i32, i32, i32, i32, i32
  }
  func.func @transform_2(%arg0: i32, %arg1: i32) -> (i32, i32, i32, i32, i32) {
    %c1_i32 = arith.constant 1 : i32
    %0 = arith.addi %arg1, %c1_i32 : i32
    %c1_i32_0 = arith.constant 1 : i32
    %1 = arith.muli %0, %c1_i32_0 : i32
    %c3_i32 = arith.constant 3 : i32
    %2 = arith.minsi %1, %c3_i32 : i32
    %c0_i32 = arith.constant 0 : i32
    %c0_i32_1 = arith.constant 0 : i32
    %c0_i32_2 = arith.constant 0 : i32
    %c0_i32_3 = arith.constant 0 : i32
    return %arg0, %2, %c0_i32, %c0_i32_1, %c0_i32_2 : i32, i32, i32, i32, i32
  }
  func.func @transform_3(%arg0: i32, %arg1: i32) -> (i32, i32) {
    %c0_i32 = arith.constant 0 : i32
    %c0_i32_0 = arith.constant 0 : i32
    %c0_i32_1 = arith.constant 0 : i32
    return %c0_i32, %c0_i32_0 : i32, i32
  }
  func.func @transform_4(%arg0: i32, %arg1: i32) -> (i32, i32) {
    %c0_i32 = arith.constant 0 : i32
    %c0_i32_0 = arith.constant 0 : i32
    %c0_i32_1 = arith.constant 0 : i32
    return %c0_i32, %c0_i32_0 : i32, i32
  }
  func.func @transform_5(%arg0: i32, %arg1: i32) -> (i32, i32) {
    %c0_i32 = arith.constant 0 : i32
    %c0_i32_0 = arith.constant 0 : i32
    %c0_i32_1 = arith.constant 0 : i32
    return %c0_i32, %c0_i32_0 : i32, i32
  }
  func.func @transform_6(%arg0: i32, %arg1: i32) -> (i32, i32) {
    %c0_i32 = arith.constant 0 : i32
    %c0_i32_0 = arith.constant 0 : i32
    %c0_i32_1 = arith.constant 0 : i32
    return %c0_i32, %c0_i32_0 : i32, i32
  }
  func.func @transform_7(%arg0: i32, %arg1: i32) -> (i32, i32, i32, i32) {
    %c0_i32 = arith.constant 0 : i32
    %c0_i32_0 = arith.constant 0 : i32
    %c0_i32_1 = arith.constant 0 : i32
    return %arg0, %arg1, %c0_i32, %c0_i32_0 : i32, i32, i32, i32
  }
}

</mosaic_0001>

<bundles_post_ra>
// kernel: down_conv.1
= control target key start
LH: loop header
LB: loop body
LE: loop exit
PB: predicated region body
PF: predicated region fallthrough
CT: control target
= control target key end

     0   :  { %s1776_s24 = smov 0   ;;  %s1778_s25 = smov 0   ;;  %s2085_s0 = inlined_call_operand.vmem [shape: f32[2,8,2,8,8], index: 0, kind: input, shape index: {}, may-alias: {0,1,2}]   ;;  %s2086_s1 = inlined_call_operand.vmem [shape: f32[2,8,2,8,8], index: 1, kind: input, shape index: {}, may-alias: {0,1,2}]   ;;  %s2087_s2 = inlined_call_operand.vmem [shape: f32[2,8,2,8,8], index: 2, kind: input, shape index: {}, may-alias: {0,1,2}]   ;;  %s2088_s3 = inlined_call_operand.vmem [shape: f32[36,8], index: 3, kind: input, shape index: {}]   ;;  %s2089_s4 = inlined_call_operand.vmem [shape: f32[1,8], index: 4, kind: input, shape index: {}]   ;;  %s2090_s5 = inlined_call_operand.vmem [shape: f32[72,8], index: 5, kind: input, shape index: {}]   ;;  %s2091_s6 = inlined_call_operand.vmem [shape: f32[1,8], index: 6, kind: input, shape index: {}]   ;;  %s2092_s7 = inlined_call_operand.vmem [shape: f32[2,8,8,8], index: 7, kind: output, shape index: {}]  }
   0x1   :  { %2093 = sst [smem:[#allocation4_spill]] %s2085_s0  ;;  %s1780_s26 = smov 0  }
   0x2   :  { %s1782_s27 = smov 0   ;;  %s1784_s28 = smov 0  }
   0x3 LB: > { %s26_s29 = sadd.s32 1, %s1714_s26  ;;  %s29_s30 = sadd.s32 1, %s1718_s27  ;;  %s1722_s28 = sphi %s1784_s28, %s17_s28   ;;  %s1718_s27 = sphi %s1782_s27, %s2100_s27   ;;  %s1714_s26 = sphi %s1780_s26, %s2099_s26   ;;  %s1710_s25 = sphi %s1778_s25, %s2098_s25   ;;  %s1706_s24 = sphi %s1776_s24, %s2097_s24  }
   0x4   : > { %p27_p0 = scmp.ge.s32.totalorder %s26_s29, 4  ;;  %p1450_p1 = scmp.ge.s32.totalorder %s1722_s28, 1 }
   0x5   : > { %p319_p2 = scmp.lt.s32.totalorder %s1722_s28, 9 }
   0x6   : > { %s2102_s29 = smov (%p27_p0, %s26_s29), 0  ;;  %s2104_s30 = smov (!%p27_p0, %s29_s30), %s1718_s27 }
   0x7   : > { %p320_p3 = pnand %p1450_p1, %p319_p2  ;;  %p31_p4 = scmp.ge.s32.totalorder %s2104_s30, 2 }
   0x8   : > { %s1451_s8 = sshll.u32 (!%p320_p3), %s1706_s24, 1  ;;  %p387_p5 = scmp.lt.s32.totalorder (!%p320_p3), %s1710_s25, 1  ;;  %vm441_vm0 = vcmask (!%p320_p3), 24576   ;;  %v1724_v2 = vmov (!%p320_p3), 0.0   ;;  %vm471_vm1 = vcmask (!%p320_p3), 31744  }
   0x9   : > { %s2106_s30 = smov (%p31_p4, %s2104_s30), 0  ;;  %323 = sbr.rel (%p320_p3) target bundleno = 1141 (0x475), region = 48 }
   0xa   : > { %p389_p6 = scmp.lt.s32.totalorder (!%p320_p3), %s1451_s8, 7  ;;  %s1455_s9 = sadd.s32 (!%p320_p3), 4294967295, %s1706_s24  ;;  %442 = vst.msk [vmem:[#allocation2] sm:$0x1] (!%p320_p3), %vm441_vm0, %v1724_v2  ;;  %443 = vst.msk [vmem:[#allocation2 + $0x10] sm:$0x1] (!%p320_p3), %vm441_vm0, %v1724_v2 }
   0xb   : > { %p398_p7 = scmp.gt.s32.totalorder (!%p320_p3), %s1455_s9, 0  ;;  %s414_s12 = sadd.s32 (!%p320_p3), 1, %s1706_s24  ;;  %444 = vst.msk [vmem:[#allocation2 + $0x20] sm:$0x1] (!%p320_p3), %vm441_vm0, %v1724_v2  ;;  %445 = vst.msk [vmem:[#allocation2 + $0x30] sm:$0x1] (!%p320_p3), %vm441_vm0, %v1724_v2 }
   0xc   : > { %p415_p8 = scmp.lt.s32.totalorder (!%p320_p3), %s414_s12, 3  ;;  %s2094_s0 = sld [smem:[#allocation4_spill]] (!%p320_p3)  ;;  %446 = vst.msk [vmem:[#allocation2 + $0x40] sm:$0x1] (!%p320_p3), %vm441_vm0, %v1724_v2  ;;  %447 = vst.msk [vmem:[#allocation2 + $0x50] sm:$0x1] (!%p320_p3), %vm441_vm0, %v1724_v2 }
   0xd   : > { %448 = vst.msk [vmem:[#allocation2 + $0x9] sm:$0x1] (!%p320_p3), %vm441_vm0, %v1724_v2  ;;  %449 = vst.msk [vmem:[#allocation2 + $0x19] sm:$0x1] (!%p320_p3), %vm441_vm0, %v1724_v2  ;;  %p1467_p11 = scmp.ne.s32.totalorder (!%p320_p3), %s1706_s24, 0 }
   0xe   : > { %450 = vst.msk [vmem:[#allocation2 + $0x29] sm:$0x1] (!%p320_p3), %vm441_vm0, %v1724_v2  ;;  %451 = vst.msk [vmem:[#allocation2 + $0x39] sm:$0x1] (!%p320_p3), %vm441_vm0, %v1724_v2 }
   0xf   : > { %452 = vst.msk [vmem:[#allocation2 + $0x49] sm:$0x1] (!%p320_p3), %vm441_vm0, %v1724_v2  ;;  %453 = vst.msk [vmem:[#allocation2 + $0x59] sm:$0x1] (!%p320_p3), %vm441_vm0, %v1724_v2 }
  0x10   : > { %s2108_s25 = smov (!%p387_p5, %s1710_s25), 1  ;;  %s2110_s8 = smov (!%p389_p6, %s1451_s8), 7 }
  0x11   : > { %s1810_s10 = sshll.u32 %s2108_s25, 4  ;;  %s1452_s11 = sshll.u32 %s2110_s8, 1  ;;  %v1726_v11 = vmov (!%p1467_p11), 0.0  }
  0x12   : > { %s393_s13 = sadd.s32 %s1810_s10, %s1452_s11  ;;  %s1465_s15 = sshll.u32 %s2108_s25, 3  ;;  %478 = vst.msk [vmem:[#allocation2 + $0x1] sm:$0xff] (!%p1467_p11), %vm471_vm1, %v1726_v11  ;;  %479 = vst.msk [vmem:[#allocation2 + $0x11] sm:$0xff] (!%p1467_p11), %vm471_vm1, %v1726_v11 }
  0x13   : > { %s1454_s14 = sshll.u32 %s393_s13, 3  ;;  %s437_s19 = sadd.s32 %s1465_s15, %s2110_s8 }
  0x14   : > { %s395_s18 = scalar_lea.vmem %s2094_s0, %s1454_s14  ;;  %s2112_s9 = smov (!%p398_p7, %s1455_s9), 0 }
  0x15   : > { %s2114_s12 = smov (!%p415_p8, %s414_s12), 3  ;;  %v454_v0 = vld [vmem:[%s395_s18] sm:$0xff]  ;;  %v455_v1 = vld [vmem:[%s395_s18 + $0x8] sm:$0xff]  ;;  %s1456_s20 = sshll.u32 %s2112_s9, 1  ;;  %v456_v4 = vld [vmem:[%s395_s18 + $0x10] sm:$0xff] }
  0x16   : > { %s1466_s21 = sshll.u32 %s437_s19, 3  ;;  %p403_p9 = scmp.lt.s32.totalorder %s1456_s20, 7  ;;  %v458_v3 = vmax.f32 %v454_v0, %v455_v1  ;;  %v457_v5 = vld [vmem:[%s395_s18 + $0x18] sm:$0xff] }
  0x17   : > { %s1460_s22 = sshll.u32 %s2114_s12, 1  ;;  %s1844_s8 = scalar_lea.vmem %s2092_s7, %s1466_s21  ;;  %v459_v6 = vmax.f32 %v456_v4, %v457_v5 }
  0x18   : > { %p420_p10 = scmp.lt.s32.totalorder %s1460_s22, 7  ;;  %s2116_s20 = smov (!%p403_p9, %s1456_s20), 7 }
  0x19   : > { %s1457_s11 = sshll.u32 %s2116_s20, 1  ;;  %s1725_s15 = smov 124  }
  0x1a   : > { %s2118_s22 = smov (!%p420_p10, %s1460_s22), 7  ;;  %s407_s13 = sadd.s32 %s1457_s11, %s1810_s10  ;;  %462 = vrot.lane.b32.xlu0 %v458_v3, %s1725_s15 }
  0x1b   : > { %s1461_s14 = sshll.u32 %s2118_s22, 1  ;;  %s1459_s9 = sshll.u32 %s407_s13, 3 }
  0x1c   : > { %s424_s16 = sadd.s32 %s1461_s14, %s1810_s10  ;;  %s409_s19 = scalar_lea.vmem %s2086_s1, %s1459_s9 }
  0x1d   : > { %s1463_s23 = sshll.u32 %s424_s16, 3 }
  0x1e   : > { %s1854_s0 = scalar_lea.vmem %s2087_s2, %s1463_s23  ;;  %464 = vrot.lane.b32.xlu0 %v459_v6, %s1725_s15 }
  0x8c   : > { %v463_v7 = vpop.permute.xlu0 %462 }
  0x8d   : > { %v468_v8 = vmax.f32 %v458_v3, %v463_v7  ;;  %477 = sbr.rel (%p1467_p11) target bundleno = 148 (0x94), region = 52 }
  0x8f   : > { %472 = vst.msk [vmem:[#allocation2 + $0x21] sm:$0xff] %vm471_vm1, %v468_v8 }
  0x90   : > { %v465_v9 = vpop.permute.xlu0 %464 }
  0x91   : > { %v469_v10 = vmax.f32 %v459_v6, %v465_v9 }
  0x93   : > { %473 = vst.msk [vmem:[#allocation2 + $0x31] sm:$0xff] %vm471_vm1, %v469_v10 }
  0x94 PF: > { %p1468_p12 = scmp.le.s32.totalorder %s1706_s24, 0 }
  0x95   : > { %v484_v12 = vld [vmem:[%s409_s19] sm:$0xff] (!%p1468_p12)  ;;  %v485_v13 = vld [vmem:[%s409_s19 + $0x8] sm:$0xff] (!%p1468_p12)  ;;  %v486_v14 = vld [vmem:[%s409_s19 + $0x10] sm:$0xff] (!%p1468_p12)  ;;  %s1727_s10 = smov (!%p1468_p12), 124  }
  0x96   : > { %483 = sbr.rel (%p1468_p12) target bundleno = 274 (0x112), region = 56  ;;  %v488_v15 = vmax.f32 (!%p1468_p12), %v484_v12, %v485_v13  ;;  %v487_v16 = vld [vmem:[%s409_s19 + $0x18] sm:$0xff] (!%p1468_p12) }
  0x97   : > { %v489_v17 = vmax.f32 (!%p1468_p12), %v486_v14, %v487_v16 }
  0x98   : > { %492 = vrot.lane.b32.xlu0 (!%p1468_p12), %v488_v15, %s1727_s10 }
  0x9c   : > { %494 = vrot.lane.b32.xlu0 (!%p1468_p12), %v489_v17, %s1727_s10 }
 0x10a   : > { %v493_v18 = vpop.permute.xlu0 %492 }
 0x10b   : > { %v498_v19 = vmax.f32 %v488_v15, %v493_v18 }
 0x10d   : > { %500 = vst.msk [vmem:[#allocation2 + $0x1] sm:$0xff] %vm471_vm1, %v498_v19 }
 0x10e   : > { %v495_v20 = vpop.permute.xlu0 %494 }
 0x10f   : > { %v499_v21 = vmax.f32 %v489_v17, %v495_v20 }
 0x111   : > { %501 = vst.msk [vmem:[#allocation2 + $0x11] sm:$0xff] %vm471_vm1, %v499_v21 }
 0x112 PF: > { %p1469_p13 = scmp.ne.s32.totalorder %s1706_s24, 3 }
 0x113   : > { %v1728_v22 = vmov (!%p1469_p13), 0.0  }
 0x114   : > { %505 = sbr.rel (%p1469_p13) target bundleno = 283 (0x11b), region = 60  ;;  %507 = vst.msk [vmem:[#allocation2 + $0x41] sm:$0xff] (!%p1469_p13), %vm471_vm1, %v1728_v22  ;;  %508 = vst.msk [vmem:[#allocation2 + $0x51] sm:$0xff] (!%p1469_p13), %vm471_vm1, %v1728_v22 }
 0x11b PF: > { %p1470_p0 = scmp.ge.s32.totalorder %s1706_s24, 3 }
 0x11c   : > { %v513_v23 = vld [vmem:[%s1854_s0] sm:$0xff] (!%p1470_p0)  ;;  %v514_v24 = vld [vmem:[%s1854_s0 + $0x8] sm:$0xff] (!%p1470_p0)  ;;  %v515_v25 = vld [vmem:[%s1854_s0 + $0x10] sm:$0xff] (!%p1470_p0)  ;;  %s1729_s18 = smov (!%p1470_p0), 124  }
 0x11d   : > { %512 = sbr.rel (%p1470_p0) target bundleno = 409 (0x199), region = 64  ;;  %v517_v26 = vmax.f32 (!%p1470_p0), %v513_v23, %v514_v24  ;;  %v516_v27 = vld [vmem:[%s1854_s0 + $0x18] sm:$0xff] (!%p1470_p0) }
 0x11e   : > { %v518_v28 = vmax.f32 (!%p1470_p0), %v515_v25, %v516_v27 }
 0x11f   : > { %521 = vrot.lane.b32.xlu0 (!%p1470_p0), %v517_v26, %s1729_s18 }
 0x123   : > { %523 = vrot.lane.b32.xlu0 (!%p1470_p0), %v518_v28, %s1729_s18 }
 0x191   : > { %v522_v29 = vpop.permute.xlu0 %521 }
 0x192   : > { %v527_v30 = vmax.f32 %v517_v26, %v522_v29 }
 0x194   : > { %530 = vst.msk [vmem:[#allocation2 + $0x41] sm:$0xff] %vm471_vm1, %v527_v30 }
 0x195   : > { %v524_v31 = vpop.permute.xlu0 %523 }
 0x196   : > { %v528_v32 = vmax.f32 %v518_v28, %v524_v31 }
 0x198   : > { %531 = vst.msk [vmem:[#allocation2 + $0x51] sm:$0xff] %vm471_vm1, %v528_v32 }
 0x199 PF: > { %v1878_v33 = vld [vmem:[#allocation2 + $0x10] sm:$0xff]  ;;  %v535_v34 = vld [vmem:[#allocation2 + $0x18] sm:$0x3]  ;;  %vm552_vm2 = vcmask 1046528   ;;  %vm577_vm3 = vcmask 1045504   ;;  %v1882_v39 = vld [vmem:[#allocation2 + $0x20] sm:$0xff] }
 0x19a   : > { %v556_v35 = vrot.slane %v1878_v33, 1  ;;  %v557_v36 = vrot.slane %v535_v34, 1  ;;  %v581_v37 = vrot.slane %v1878_v33, 2  ;;  %v582_v38 = vrot.slane %v535_v34, 2  ;;  %v537_v40 = vld [vmem:[#allocation2 + $0x28] sm:$0x3] }
 0x19b   : > { %v559_v41 = vrot.slane %v1882_v39, 1  ;;  %v584_v42 = vrot.slane %v1882_v39, 2  ;;  %v1886_v43 = vld [vmem:[#allocation2] sm:$0xff]  ;;  %v560_v46 = vrot.slane %v537_v40, 1  ;;  %v585_v47 = vrot.slane %v537_v40, 2  ;;  %s1730_s0 = smov 4  }
 0x19c   : > { %v558_v44 = vsel %vm552_vm2, %v556_v35, %v557_v36  ;;  %v583_v45 = vsel %vm577_vm3, %v581_v37, %v582_v38  ;;  %v533_v48 = vld [vmem:[#allocation2 + $0x8] sm:$0x3]  ;;  %s1731_s20 = smov 8   ;;  %v553_v49 = vrot.slane %v1886_v43, 1  ;;  %v578_v53 = vrot.slane %v1886_v43, 2  ;;  %v1896_v55 = vld [vmem:[#allocation2 + $0x30] sm:$0xff] }
 0x19d   : > { %567 = vrot.lane.b32.xlu0 %v558_v44, %s1730_s0  ;;  %592 = vrot.lane.b32.xlu1 %v583_v45, %s1731_s20  ;;  %v554_v50 = vrot.slane %v533_v48, 1  ;;  %v561_v51 = vsel %vm552_vm2, %v559_v41, %v560_v46  ;;  %v586_v52 = vsel %vm577_vm3, %v584_v42, %v585_v47  ;;  %v579_v54 = vrot.slane %v533_v48, 2  ;;  %v539_v56 = vld [vmem:[#allocation2 + $0x38] sm:$0x3]  ;;  %v629_v57 = vld [vmem:[%s2088_s3 + $0xc] sm:$0xff]  ;;  %v611_v62 = vld [vmem:[%s2088_s3] sm:$0xff] }
 0x19e   : > { %v630_v58 = vld [vmem:[%s2088_s3 + $0x14] sm:$0xf]  ;;  %v562_v60 = vrot.slane %v1896_v55, 1  ;;  %v563_v61 = vrot.slane %v539_v56, 1  ;;  %v612_v63 = vld [vmem:[%s2088_s3 + $0x8] sm:$0xf] }
 0x19f   : > { %v555_v59 = vsel %vm552_vm2, %v553_v49, %v554_v50  ;;  %v580_v0 = vsel %vm577_vm3, %v578_v53, %v579_v54  ;;  %v587_v1 = vrot.slane %v1896_v55, 2  ;;  %v588_v3 = vrot.slane %v539_v56, 2  ;;  %v1916_v4 = vld [vmem:[#allocation2 + $0x40] sm:$0xff]  ;;  %v541_v5 = vld [vmem:[#allocation2 + $0x48] sm:$0x3]  ;;  %v542_v15 = vld [vmem:[#allocation2 + $0x50] sm:$0xff] }
 0x1a0   : > { %vm644_vm4 = vcmask 1043456   ;;  %v1588_v6 = vpack.c.bf16 %v630_v58, %v629_v57  ;;  %vm1732_vm5 = vmmov 1   ;;  %v1594_v8 = vpack.c.bf16 %v612_v63, %v611_v62  ;;  %v543_v16 = vld [vmem:[#allocation2 + $0x58] sm:$0x3]  ;;  %v841_v30 = vld [vmem:[%s2088_s3 + $0x20] sm:$0xf] }
 0x1a1   : > { %569 = vrot.lane.b32.xlu0 %v561_v51, %s1730_s0  ;;  %594 = vrot.lane.b32.xlu1 %v586_v52, %s1731_s20  ;;  %vm1918_vm6 = vmpackc.low %vm644_vm4, %vm1732_vm5  ;;  %v564_v9 = vsel %vm552_vm2, %v562_v60, %v563_v61  ;;  %v615_v10 = vrot.slane %v1916_v4, 1  ;;  %v589_v11 = vsel %vm577_vm3, %v587_v1, %v588_v3  ;;  %v616_v12 = vrot.slane %v541_v5, 1  ;;  %v840_v29 = vld [vmem:[%s2088_s3 + $0x18] sm:$0xff]  ;;  %v1486_v54 = vld [vmem:[%s2089_s4] ss:$0 sm:$0xff] }
 0x1a2   : > { %v621_v13 = vrot.slane %v1916_v4, 2  ;;  %v622_v14 = vrot.slane %v541_v5, 2  ;;  %1590 = vmatprep.subr.msk.bf16.mxu0 %vm1918_vm6, %v1588_v6  ;;  %1618 = vmatprep.subr.msk.bf16.mxu1 %vm1918_vm6, %v1588_v6  ;;  %v826_v17 = vrot.slane %v542_v15, 1  ;;  %v827_v18 = vrot.slane %v543_v16, 1 }
 0x1a3   : > { %1593 = vmatpush3.bf16.msk.msra.mxu0 %vm1918_vm6, %v1588_v6  ;;  %1619 = vmatpush3.bf16.msk.msra.mxu1 %vm1918_vm6, %v1588_v6  ;;  %v617_v19 = vsel %vm552_vm2, %v615_v10, %v616_v12  ;;  %v832_v21 = vrot.slane %v542_v15, 2  ;;  %v833_v22 = vrot.slane %v543_v16, 2  ;;  %vm606_vm7 = vcmask 64512  }
 0x1a4   : > { %1596 = vmatprep.subr.msk.bf16.mxu0 %vm1918_vm6, %v1594_v8  ;;  %v623_v20 = vsel %vm577_vm3, %v621_v13, %v622_v14  ;;  %v828_v23 = vsel %vm552_vm2, %v826_v17, %v827_v18  ;;  %vm631_vm8 = vcmask 97280   ;;  %v1600_v35 = vpack.c.bf16 %v841_v30, %v840_v29 }
 0x1a5   : > { %565 = vrot.lane.b32.xlu0 %v555_v59, %s1730_s0  ;;  %590 = vrot.lane.b32.xlu1 %v580_v0, %s1731_s20  ;;  %v834_v24 = vsel %vm577_vm3, %v832_v21, %v833_v22  ;;  %vm952_vm9 = vcmask 57344   ;;  %v1733_v5 = vmov (!%p1467_p11), 0.0  }
 0x1a6   : > { %953 = vst.msk [vmem:[#allocation3] sm:$0x1] %vm952_vm9, %v1724_v2  ;;  %954 = vst.msk [vmem:[#allocation3 + $0x10] sm:$0x1] %vm952_vm9, %v1724_v2 }
 0x1a7   : > { %955 = vst.msk [vmem:[#allocation3 + $0x20] sm:$0x1] %vm952_vm9, %v1724_v2  ;;  %956 = vst.msk [vmem:[#allocation3 + $0x30] sm:$0x1] %vm952_vm9, %v1724_v2 }
 0x1a8   : > { %957 = vst.msk [vmem:[#allocation3 + $0x9] sm:$0x1] %vm952_vm9, %v1724_v2  ;;  %958 = vst.msk [vmem:[#allocation3 + $0x19] sm:$0x1] %vm952_vm9, %v1724_v2 }
 0x1a9   : > { %571 = vrot.lane.b32.xlu0 %v564_v9, %s1730_s0  ;;  %596 = vrot.lane.b32.xlu1 %v589_v11, %s1731_s20  ;;  %959 = vst.msk [vmem:[#allocation3 + $0x29] sm:$0x1] %vm952_vm9, %v1724_v2  ;;  %960 = vst.msk [vmem:[#allocation3 + $0x39] sm:$0x1] %vm952_vm9, %v1724_v2 }
 0x1ad   : > { %618 = vrot.lane.b32.xlu0 %v617_v19, %s1730_s0  ;;  %624 = vrot.lane.b32.xlu1 %v623_v20, %s1731_s20 }
 0x1b1   : > { %829 = vrot.lane.b32.xlu0 %v828_v23, %s1730_s0  ;;  %835 = vrot.lane.b32.xlu1 %v834_v24, %s1731_s20 }
 0x20f   : > { %v568_v25 = vpop.permute.xlu0 %567  ;;  %v593_v26 = vpop.permute.xlu1 %592 }
 0x210   : > { %v603_v27 = vsel %vm471_vm1, %v1878_v33, %v568_v25 }
 0x211   : > { %v608_v28 = vsel %vm606_vm7, %v603_v27, %v593_v26 }
 0x212   : > { %1535 = vmatprep.mubr.msk.f32.mxu0 %vm631_vm8, %v608_v28 }
 0x213   : > { %v570_v31 = vpop.permute.xlu0 %569  ;;  %v595_v32 = vpop.permute.xlu1 %594 }
 0x214   : > { %v604_v34 = vsel %vm471_vm1, %v1882_v39, %v570_v31 }
 0x215   : > { %v609_v33 = vsel %vm606_vm7, %v604_v34, %v595_v32 }
 0x216   : > { %1536 = vmatmul.mubr.msk.f32.vlgmr.msra.gmra.mrb[0].mxu0 %vm631_vm8, %v609_v33 }
 0x217   : > { %1599 = vmatpush3.bf16.msk.msra.mxu0 %vm1918_vm6, %v1594_v8  ;;  %v566_v36 = vpop.permute.xlu0 %565  ;;  %v591_v37 = vpop.permute.xlu1 %590 }
 0x218   : > { %v602_v38 = vsel %vm471_vm1, %v1886_v43, %v566_v36  ;;  %1602 = vmatprep.subr.msk.bf16.mxu0 %vm1918_vm6, %v1600_v35 }
 0x219   : > { %v607_v40 = vsel %vm606_vm7, %v602_v38, %v591_v37 }
 0x21a   : > { %1545 = vmatprep.mubr.msk.f32.mxu0 %vm631_vm8, %v607_v40 }
 0x21b   : > { %v572_v39 = vpop.permute.xlu0 %571  ;;  %v597_v41 = vpop.permute.xlu1 %596 }
 0x21c   : > { %v605_v42 = vsel %vm471_vm1, %v1896_v55, %v572_v39 }
 0x21d   : > { %v610_v44 = vsel %vm606_vm7, %v605_v42, %v597_v41 }
 0x21e   : > { %1546 = vmatmul.mubr.msk.f32.vlgmr.msra.gmra.mrb[0].mxu0 %vm631_vm8, %v608_v28  ;;  %1538 = vmatprep.mubr.msk.f32.mxu1 %vm631_vm8, %v610_v44 }
 0x21f   : > { %1605 = vmatpush3.bf16.msk.msra.mxu0 %vm1918_vm6, %v1600_v35  ;;  %1548 = vmatprep.mubr.msk.f32.mxu0 %vm631_vm8, %v609_v33  ;;  %v619_v43 = vpop.permute.xlu0 %618  ;;  %v625_v45 = vpop.permute.xlu1 %624 }
 0x220   : > { %v627_v46 = vsel %vm471_vm1, %v1916_v4, %v619_v43 }
 0x221   : > { %v628_v47 = vsel %vm606_vm7, %v627_v46, %v625_v45 }
 0x222   : > { %1549 = vmatmul.mubr.msk.f32.gmra.mrb[2].mxu0 %vm631_vm8, %v610_v44  ;;  %1539 = vmatmul.mubr.msk.f32.vlgmr.msra.gmra.mrb[0].mxu1 %vm631_vm8, %v628_v47 }
 0x223   : > { %1555 = vmatprep.mubr.msk.f32.mxu0 %vm631_vm8, %v609_v33  ;;  %v830_v48 = vpop.permute.xlu0 %829  ;;  %v836_v50 = vpop.permute.xlu1 %835 }
 0x224   : > { %v838_v49 = vsel %vm471_vm1, %v542_v15, %v830_v48 }
 0x225   : > { %v839_v51 = vsel %vm606_vm7, %v838_v49, %v836_v50 }
 0x226   : > { %1556 = vmatmul.mubr.msk.f32.vlgmr.msra.gmra.mrb[0].mxu0 %vm631_vm8, %v610_v44 }
 0x227   : > { %1558 = vmatprep.mubr.msk.f32.mxu0 %vm631_vm8, %v628_v47 }
 0x22a   : > { %1559 = vmatmul.mubr.msk.f32.gmra.mrb[2].mxu0 %vm631_vm8, %v839_v51 }
 0x2f5   : > { %v1540_v52 = vpop.f32.mrb[0].mxu1 }
 0x2f6   : > { %v724_v53 = vpop.f32.mrb[1].mxu1 }
 0x2f9   : > { %v1557_v55 = vpop.f32.mrb[0].mxu0 }
 0x2fa   : > { %v945_v56 = vadd.f32 %v1557_v55, %v1486_v54  ;;  %v914_v57 = vpop.f32.mrb[1].mxu0 }
 0x2fb   : > { %v944_v58 = vadd.f32 %v1486_v54, %v914_v57 }
 0x2fc   : > { %v949_v59 = vmax.f32 %v945_v56, 0.0 }
 0x2fd   : > { %v948_v60 = vmax.f32 %v944_v58, 0.0  ;;  %v1560_v61 = vpop.f32.mrb[2].mxu0 }
 0x2fe   : > { %962 = vst.msk [vmem:[#allocation3 + $0x11] sm:$0xff] %vm606_vm7, %v949_v59  ;;  %v1620_v62 = vadd.f32 %v1560_v61, %v1540_v52  ;;  %v924_v63 = vpop.f32.mrb[3].mxu0 }
 0x2ff   : > { %961 = vst.msk [vmem:[#allocation3 + $0x1] sm:$0xff] %vm606_vm7, %v948_v60  ;;  %v1621_v2 = vadd.f32 %v924_v63, %v724_v53  ;;  %967 = sbr.rel (%p1467_p11) target bundleno = 774 (0x306), region = 68 }
 0x300   : > { %v947_v0 = vadd.f32 %v1620_v62, %v1486_v54  ;;  %968 = vst.msk [vmem:[#allocation3 + $0x1] sm:$0xff] (!%p1467_p11), %vm606_vm7, %v1733_v5 }
 0x301   : > { %v946_v1 = vadd.f32 %v1621_v2, %v1486_v54 }
 0x302   : > { %v951_v3 = vmax.f32 %v947_v0, 0.0 }
 0x303   : > { %v950_v4 = vmax.f32 %v946_v1, 0.0 }
 0x304   : > { %964 = vst.msk [vmem:[#allocation3 + $0x31] sm:$0xff] %vm606_vm7, %v951_v3 }
 0x305   : > { %963 = vst.msk [vmem:[#allocation3 + $0x21] sm:$0xff] %vm606_vm7, %v950_v4 }
 0x306 PF: > { %971 = sbr.rel (%p1469_p13) target bundleno = 781 (0x30d), region = 72  ;;  %v1734_v6 = vmov (!%p1469_p13), 0.0  }
 0x307   : > { %973 = vst.msk [vmem:[#allocation3 + $0x31] sm:$0xff] (!%p1469_p13), %vm606_vm7, %v1734_v6 }
 0x30d PF: > { %v978_v7 = vld [vmem:[#allocation3 + $0x20] sm:$0xff]  ;;  %v979_v8 = vld [vmem:[#allocation3 + $0x28] sm:$0x3]  ;;  %v976_v9 = vld [vmem:[#allocation3 + $0x10] sm:$0xff]  ;;  %s1735_s12 = smov 16   ;;  %vm1012_vm10 = vcmask 130048  }
 0x30e   : > { %v1020_v10 = vrot.slane %v978_v7, 1  ;;  %v1021_v11 = vrot.slane %v979_v8, 1  ;;  %v977_v12 = vld [vmem:[#allocation3 + $0x18] sm:$0x3]  ;;  %v989_v13 = vrot.slane %v976_v9, 1  ;;  %v1026_v14 = vrot.slane %v978_v7, 2 }
 0x30f   : > { %v990_v15 = vrot.slane %v977_v12, 1  ;;  %v1027_v16 = vrot.slane %v979_v8, 2  ;;  %v1001_v17 = vrot.slane %v976_v9, 2  ;;  %v1002_v18 = vrot.slane %v977_v12, 2  ;;  %v974_v19 = vld [vmem:[#allocation3] sm:$0xff]  ;;  %v1034_v23 = vld [vmem:[%s2090_s5 + $0x18] sm:$0xff] }
 0x310   : > { %v1022_v20 = vsel %vm552_vm2, %v1020_v10, %v1021_v11  ;;  %v975_v21 = vld [vmem:[#allocation3 + $0x8] sm:$0x3]  ;;  %v1035_v24 = vld [vmem:[%s2090_s5 + $0x20] sm:$0xff]  ;;  %v998_v26 = vrot.slane %v974_v19, 2  ;;  %v986_v29 = vrot.slane %v974_v19, 1  ;;  %v980_v31 = vld [vmem:[#allocation3 + $0x30] sm:$0xff] }
 0x311   : > { %1023 = vrot.lane.b32.xlu1 %v1022_v20, %s1731_s20  ;;  %v991_v22 = vsel %vm552_vm2, %v989_v13, %v990_v15  ;;  %v1028_v25 = vsel %vm577_vm3, %v1026_v14, %v1027_v16  ;;  %v999_v27 = vrot.slane %v975_v21, 2  ;;  %v1003_v28 = vsel %vm577_vm3, %v1001_v17, %v1002_v18  ;;  %v981_v32 = vld [vmem:[#allocation3 + $0x38] sm:$0x3]  ;;  %v1036_v35 = vld [vmem:[%s2090_s5 + $0x28] sm:$0xff]  ;;  %v1015_v33 = vld [vmem:[%s2090_s5] sm:$0xff] }
 0x312   : > { %994 = vrot.lane.b32.xlu0 %v991_v22, %s1731_s20  ;;  %v987_v30 = vrot.slane %v975_v21, 1  ;;  %v1606_v34 = vpack.c.bf16 %v1035_v24, %v1034_v23  ;;  %v1016_v36 = vld [vmem:[%s2090_s5 + $0x8] sm:$0xff]  ;;  %v1205_v38 = vrot.slane %v980_v31, 2  ;;  %v1206_v40 = vrot.slane %v981_v32, 2  ;;  %v1017_v54 = vld [vmem:[%s2090_s5 + $0x10] sm:$0xff]  ;;  %v1214_v56 = vld [vmem:[%s2090_s5 + $0x38] sm:$0xff] }
 0x313   : > { %v1000_v37 = vsel %vm577_vm3, %v998_v26, %v999_v27  ;;  %v1199_v41 = vrot.slane %v980_v31, 1  ;;  %v1200_v42 = vrot.slane %v981_v32, 1  ;;  %v1610_v44 = vpack.c.bf16 %v1016_v36, %v1015_v33  ;;  %v1213_v55 = vld [vmem:[%s2090_s5 + $0x30] sm:$0xff]  ;;  %v1215_v62 = vld [vmem:[%s2090_s5 + $0x40] sm:$0xff] }
 0x314   : > { %1607 = vmatprep.subr.bf16.mxu1 %v1606_v34  ;;  %v988_v39 = vsel %vm552_vm2, %v986_v29, %v987_v30  ;;  %v1207_v43 = vsel %vm577_vm3, %v1205_v38, %v1206_v40  ;;  %vm1037_vm11 = vcmask 195584   ;;  %v1614_v60 = vpack.c.bf16 %v1214_v56, %v1213_v55  ;;  %v1495_v3 = vld [vmem:[%s2091_s6] ss:$0 sm:$0xff] }
 0x315   : > { %1029 = vrot.lane.b32.xlu1 %v1028_v25, %s1735_s12  ;;  %1609 = vmatpush3.bf16.msra.mxu1 %v1606_v34  ;;  %v1201_v45 = vsel %vm552_vm2, %v1199_v41, %v1200_v42 }
 0x316   : > { %1006 = vrot.lane.b32.xlu0 %v1003_v28, %s1735_s12  ;;  %1565 = vmatprep.subr.mxu1 %v1036_v35 }
 0x319   : > { %1004 = vrot.lane.b32.xlu1 %v1000_v37, %s1735_s12  ;;  %1566 = vmatpush3.msra.mxu1 %v1036_v35 }
 0x31a   : > { %992 = vrot.lane.b32.xlu0 %v988_v39, %s1731_s20  ;;  %1611 = vmatprep.subr.bf16.mxu1 %v1610_v44 }
 0x31d   : > { %1208 = vrot.lane.b32.xlu1 %v1207_v43, %s1735_s12 }
 0x31e   : > { %1202 = vrot.lane.b32.xlu0 %v1201_v45, %s1731_s20 }
 0x383   : > { %v1024_v46 = vpop.permute.xlu1 %1023 }
 0x384   : > { %v995_v47 = vpop.permute.xlu0 %994  ;;  %v1032_v48 = vsel %vm606_vm7, %v978_v7, %v1024_v46 }
 0x385   : > { %v1011_v50 = vsel %vm606_vm7, %v976_v9, %v995_v47 }
 0x387   : > { %v1030_v49 = vpop.permute.xlu1 %1029 }
 0x388   : > { %v1033_v51 = vsel %vm1012_vm10, %v1032_v48, %v1030_v49  ;;  %v1007_v52 = vpop.permute.xlu0 %1006 }
 0x389   : > { %v1014_v53 = vsel %vm1012_vm10, %v1011_v50, %v1007_v52 }
 0x38a   : > { %1567 = vmatprep.mubr.msk.f32.mxu1 %vm1037_vm11, %v1014_v53 }
 0x38b   : > { %1568 = vmatmul.mubr.msk.f32.vlgmr.msra.gmra.mrb[2].mxu1 %vm1037_vm11, %v1033_v51  ;;  %v1005_v57 = vpop.permute.xlu1 %1004 }
 0x38c   : > { %1613 = vmatpush3.bf16.msra.mxu1 %v1610_v44  ;;  %v993_v58 = vpop.permute.xlu0 %992 }
 0x38d   : > { %1574 = vmatprep.subr.mxu1 %v1017_v54  ;;  %v1010_v59 = vsel %vm606_vm7, %v974_v19, %v993_v58 }
 0x38e   : > { %v1013_v61 = vsel %vm1012_vm10, %v1010_v59, %v1005_v57 }
 0x38f   : > { %1576 = vmatprep.mubr.msk.f32.mxu1 %vm1037_vm11, %v1013_v61  ;;  %v1209_v0 = vpop.permute.xlu1 %1208 }
 0x390   : > { %1575 = vmatpush3.msra.mxu1 %v1017_v54  ;;  %v1203_v63 = vpop.permute.xlu0 %1202 }
 0x391   : > { %1615 = vmatprep.subr.bf16.mxu1 %v1614_v60  ;;  %v1211_v2 = vsel %vm606_vm7, %v980_v31, %v1203_v63 }
 0x392   : > { %v1212_v1 = vsel %vm1012_vm10, %v1211_v2, %v1209_v0 }
 0x393   : > { %1577 = vmatmul.mubr.msk.f32.vlgmr.msra.gmra.mrb[2].mxu1 %vm1037_vm11, %v1014_v53 }
 0x394   : > { %1617 = vmatpush3.bf16.msra.mxu1 %v1614_v60  ;;  %1585 = vmatprep.mubr.msk.f32.mxu1 %vm1037_vm11, %v1033_v51 }
 0x395   : > { %1583 = vmatprep.subr.mxu1 %v1215_v62 }
 0x398   : > { %1584 = vmatpush3.msra.mxu1 %v1215_v62 }
 0x39b   : > { %1586 = vmatmul.mubr.msk.f32.vlgmr.msra.gmra.mrb[2].mxu1 %vm1037_vm11, %v1212_v1 }
 0x46e   : > { %v1587_v4 = vpop.f32.mrb[2].mxu1 }
 0x46f   : > { %v1304_v5 = vadd.f32 %v1587_v4, %v1495_v3  ;;  %v1285_v6 = vpop.f32.mrb[3].mxu1 }
 0x470   : > { %v1303_v7 = vadd.f32 %v1495_v3, %v1285_v6 }
 0x471   : > { %v1306_v8 = vmax.f32 %v1304_v5, 0.0 }
 0x472   : > { %v1305_v9 = vmax.f32 %v1303_v7, 0.0 }
 0x473   : > { %1308 = vst.msk [vmem:[%s1844_s8 + $0x8] sm:$0xff] %vm606_vm7, %v1306_v8 }
 0x474   : > { %1307 = vst.msk [vmem:[%s1844_s8] sm:$0xff] %vm606_vm7, %v1305_v9 }
 0x475 PF: > { %s17_s28 = sadd.s32 1, %s1722_s28   ;;  %s2097_s24 = smov %s1714_s26 }
 0x476   : > { %p14_p1 = scmp.ge.s32.totalorder %s17_s28, 10   ;;  %s2098_s25 = smov %s1718_s27 }
 0x477   : > { %s2099_s26 = smov %s2102_s29  ;;  %s2100_s27 = smov %s2106_s30 }
 0x478   :  { %16 = sbr.rel (!%p14_p1) target bundleno = 3 (0x3), region = 112 }

</bundles_post_ra>
